<compile_context>
chip_gen: v7x
topology: tpu7x:2x2x1
jax: 0.10.0
libtpu: 0.0.40
codegen_flags: <defaults>
</compile_context>

<pallas_src>
import jax
import jax.numpy as jnp
from jax.experimental import pallas as pl
from jax.experimental.pallas import tpu as pltpu


def _make_gcn_kernel(depth, in_feats, out_dims):
    """depth GraphConv layers over the block-diagonal batched graph.

    Refs:
      a_ref : (BN, BN)  bf16  normalized block-diagonal adjacency
      x_ref : (BN, Fin) f32   node features (batch folded into rows)
      W_i   : (Fin_i, Fout_i) bf16
      b_i   : (1, Fout_i)     f32
      o_ref : (BN, total_out) f32
    """

    def kernel(*refs):
        a_ref = refs[0]
        x_ref = refs[1]
        param_refs = refs[2:2 + 2 * depth]
        o_ref = refs[2 + 2 * depth]

        a = a_ref[...]            # bf16, resident across all layers
        h = x_ref[...]            # f32

        # Input features are part of the concatenated output -> write directly.
        o_ref[:, 0:in_feats] = h
        off = in_feats

        for i in range(depth):
            w = param_refs[2 * i][...]         # bf16 (Fin_i, Fout_i)
            b = param_refs[2 * i + 1][...]     # f32  (1, Fout_i)
            # Message passing:  Â @ H   (MXU, bf16 inputs, f32 accumulation).
            agg = jnp.dot(a, h.astype(jnp.bfloat16),
                          preferred_element_type=jnp.float32)
            # Dense layer:  agg @ W + b.
            h = jnp.dot(agg.astype(jnp.bfloat16), w,
                        preferred_element_type=jnp.float32) + b
            if i < depth - 1:
                h = jnp.maximum(h, 0.0)        # ReLU on hidden layers only.
            f_out = out_dims[i]
            # Write the layer output straight into its lane slice (no concat).
            o_ref[:, off:off + f_out] = h
            off += f_out

    return kernel


def gcn_forward_pallas(a_hat, x, weights, biases):
    """a_hat: (N, N) f32 normalized adjacency of one graph;
    x: (B, N, in_feats) f32; weights[i]: (F_in_i, F_out_i); biases[i]: (F_out_i,)."""
    depth = len(weights)
    B, N, in_feats = x.shape
    BN = B * N
    out_dims = [int(w.shape[1]) for w in weights]
    total_out = in_feats + sum(out_dims)

    # Block-diagonal batched adjacency — exactly what GCN.make_graph builds.
    # (For large B one would instead fold the batch into lanes:
    #  Â @ reshape(X, (N, B*F)) — avoids the O(B^2 N^2) block-diagonal matmul.)
    a_big = jnp.kron(jnp.eye(B, dtype=jnp.float32), a_hat).astype(jnp.bfloat16)
    x2 = x.reshape(BN, in_feats)

    param_args, param_specs = [], []
    for w, b in zip(weights, biases):
        param_args += [w.astype(jnp.bfloat16),
                       b.reshape(1, -1).astype(jnp.float32)]
        param_specs += [
            pl.BlockSpec(w.shape, lambda i: (0, 0)),
            pl.BlockSpec((1, int(b.shape[0])), lambda i: (0, 0)),
        ]

    kernel = _make_gcn_kernel(depth, in_feats, out_dims)

    out2 = pl.pallas_call(
        kernel,
        out_shape=jax.ShapeDtypeStruct((BN, total_out), jnp.float32),
        grid_spec=pltpu.PrefetchScalarGridSpec(
            num_scalar_prefetch=0,
            grid=(1,),  # single step: whole batched graph processed at once
            in_specs=[
                pl.BlockSpec((BN, BN), lambda i: (0, 0)),
                pl.BlockSpec((BN, in_feats), lambda i: (0, 0)),
            ] + param_specs,
            out_specs=pl.BlockSpec((BN, total_out), lambda i: (0, 0)),
        ),
        compiler_params=pltpu.CompilerParams(
            dimension_semantics=("arbitrary",)),
    )(a_big, x2, *param_args)

    return out2.reshape(B, N, total_out)


def build_normalized_adjacency(src, dst, num_node):
    """Dense Â = D_in^{-1/2} A D_out^{-1/2}, A[v,u]=#edges u->v, degrees clamped to >=1."""
    A = jnp.zeros((num_node, num_node), jnp.float32).at[dst, src].add(1.0)
    out_deg = jnp.clip(A.sum(axis=0), 1.0, None)   # out-degree of source nodes
    in_deg = jnp.clip(A.sum(axis=1), 1.0, None)    # in-degree of destination nodes
    return (in_deg ** -0.5)[:, None] * A * (out_deg ** -0.5)[None, :]


def gcn_forward_ref_f32(a_hat, x, weights, biases):
    """Pure f32 reference (module semantics)."""
    depth = len(weights)
    h = x
    outs = [h]
    for i in range(depth):
        h = jnp.einsum('vu,buf->bvf', a_hat, h) @ weights[i] + biases[i]
        if i < depth - 1:
            h = jnp.maximum(h, 0.0)
        outs.append(h)
    return jnp.concatenate(outs, axis=-1)


def gcn_forward_ref_bf16(a_hat, x, weights, biases):
    """Reference emulating the kernel's bf16-input / f32-accumulate matmuls."""
    depth = len(weights)
    a = a_hat.astype(jnp.bfloat16)
    h = x
    outs = [h]
    for i in range(depth):
        agg = jnp.einsum('vu,buf->bvf', a, h.astype(jnp.bfloat16),
                         preferred_element_type=jnp.float32)
        h = jnp.einsum('bvf,fg->bvg', agg.astype(jnp.bfloat16),
                       weights[i].astype(jnp.bfloat16),
                       preferred_element_type=jnp.float32) + biases[i]
        if i < depth - 1:
            h = jnp.maximum(h, 0.0)
        outs.append(h)
    return jnp.concatenate(outs, axis=-1)


if __name__ == "__main__":
    # Small config consistent with the module's __init__.
    batch = 2
    num_node = 16
    in_feats = 8
    mid_dim = 16
    out_feats = 8
    depth = 3

    key = jax.random.PRNGKey(0)
    k_feat, k_edges, *k_params = jax.random.split(key, 2 + 2 * depth)

    # Deterministic synthetic graph: a ring plus a few extra edges.
    ring_src = jnp.arange(num_node, dtype=jnp.int32)
    ring_dst = (ring_src + 1) % num_node
    extra_src = jnp.array([0, 3, 7, 11], dtype=jnp.int32)
    extra_dst = jnp.array([8, 12, 2, 5], dtype=jnp.int32)
    src = jnp.concatenate([ring_src, ring_dst, extra_src])
    dst = jnp.concatenate([ring_dst, ring_src, extra_dst])
    a_hat = build_normalized_adjacency(src, dst, num_node)

    # Node features [batch, num_node, in_feats].
    x = jax.random.normal(k_feat, (batch, num_node, in_feats), jnp.float32)

    # Layer parameters (glorot-ish deterministic init; biases zero like DGL default).
    dims = [in_feats] + [mid_dim] * (depth - 1) + [out_feats]
    weights, biases = [], []
    for i in range(depth):
        fan_in, fan_out = dims[i], dims[i + 1]
        scale = (2.0 / (fan_in + fan_out)) ** 0.5
        weights.append(scale * jax.random.normal(k_params[i], (fan_in, fan_out), jnp.float32))
        biases.append(jnp.zeros((fan_out,), jnp.float32))

    out = gcn_forward_pallas(a_hat, x, weights, biases)
    out = jax.block_until_ready(out)

    total_out = in_feats + mid_dim * (depth - 1) + out_feats
    assert out.shape == (batch, num_node, total_out)

    # Tight check against a reference using the same bf16-input / f32-accumulate math.
    ref_bf16 = gcn_forward_ref_bf16(a_hat, x, weights, biases)
    assert jnp.allclose(out, ref_bf16, atol=1e-2, rtol=1e-2)

    # Loose check against the pure-f32 module semantics (covers bf16 rounding).
    ref_f32 = gcn_forward_ref_f32(a_hat, x, weights, biases)
    assert jnp.allclose(out, ref_f32, atol=5e-2, rtol=5e-2)

    print("KERNEL_OK")
</pallas_src>

<mosaic_0001>
module attributes {stable_mosaic.version = 11 : i64} {
  func.func @kernel(%arg0: i32, %arg1: memref<32x32xbf16, #tpu.memory_space<vmem>>, %arg2: memref<32x8xf32, #tpu.memory_space<vmem>>, %arg3: memref<8x16xbf16, #tpu.memory_space<vmem>>, %arg4: memref<1x16xf32, #tpu.memory_space<vmem>>, %arg5: memref<16x16xbf16, #tpu.memory_space<vmem>>, %arg6: memref<1x16xf32, #tpu.memory_space<vmem>>, %arg7: memref<16x8xbf16, #tpu.memory_space<vmem>>, %arg8: memref<1x8xf32, #tpu.memory_space<vmem>>, %arg9: memref<32x48xf32, #tpu.memory_space<vmem>>) attributes {dimension_semantics = [#tpu.dimension_semantics<arbitrary>], iteration_bounds = array<i64: 1>, scalar_prefetch = 0 : i64, scratch_operands = 0 : i64, tpu.core_type = #tpu.core_type<tc>, window_params = [{pipeline_mode = #tpu.pipeline_mode<synchronous>, transform_indices = @transform_0, window_bounds = array<i64: 32, 32>}, {pipeline_mode = #tpu.pipeline_mode<synchronous>, transform_indices = @transform_1, window_bounds = array<i64: 32, 8>}, {pipeline_mode = #tpu.pipeline_mode<synchronous>, transform_indices = @transform_2, window_bounds = array<i64: 8, 16>}, {pipeline_mode = #tpu.pipeline_mode<synchronous>, transform_indices = @transform_3, window_bounds = array<i64: 1, 16>}, {pipeline_mode = #tpu.pipeline_mode<synchronous>, transform_indices = @transform_4, window_bounds = array<i64: 16, 16>}, {pipeline_mode = #tpu.pipeline_mode<synchronous>, transform_indices = @transform_5, window_bounds = array<i64: 1, 16>}, {pipeline_mode = #tpu.pipeline_mode<synchronous>, transform_indices = @transform_6, window_bounds = array<i64: 16, 8>}, {pipeline_mode = #tpu.pipeline_mode<synchronous>, transform_indices = @transform_7, window_bounds = array<i64: 1, 8>}, {pipeline_mode = #tpu.pipeline_mode<synchronous>, transform_indices = @transform_8, window_bounds = array<i64: 32, 48>}]} {
    %c0 = arith.constant 0 : index
    %c0_0 = arith.constant 0 : index
    %0 = vector.load %arg1[%c0, %c0_0] : memref<32x32xbf16, #tpu.memory_space<vmem>>, vector<32x32xbf16>
    %c0_1 = arith.constant 0 : index
    %c0_2 = arith.constant 0 : index
    %1 = vector.load %arg2[%c0_1, %c0_2] : memref<32x8xf32, #tpu.memory_space<vmem>>, vector<32x8xf32>
    %c0_3 = arith.constant 0 : index
    %c0_4 = arith.constant 0 : index
    %2 = vector.load %arg9[%c0_3, %c0_4] : memref<32x48xf32, #tpu.memory_space<vmem>>, vector<32x8xf32>
    tpu.vector_store %arg9[%c0_3, %c0_4], %1 {strides = array<i32>} : memref<32x48xf32, #tpu.memory_space<vmem>>, vector<32x8xf32>,
    %c0_5 = arith.constant 0 : index
    %c0_6 = arith.constant 0 : index
    %3 = vector.load %arg3[%c0_5, %c0_6] : memref<8x16xbf16, #tpu.memory_space<vmem>>, vector<8x16xbf16>
    %c0_7 = arith.constant 0 : index
    %c0_8 = arith.constant 0 : index
    %4 = vector.load %arg4[%c0_7, %c0_8] : memref<1x16xf32, #tpu.memory_space<vmem>>, vector<1x16xf32>
    %5 = arith.truncf %1 : vector<32x8xf32> to vector<32x8xbf16>
    %cst = arith.constant dense<0.000000e+00> : vector<32x8xf32>
    %6 = tpu.matmul %0, %5, %cst {dimension_numbers = #tpu.dot_dimension_numbers<[1], [0], [0], [1], [0, 0, 1, 1], [], []>} : vector<32x32xbf16>, vector<32x8xbf16>, vector<32x8xf32> -> vector<32x8xf32>
    %7 = arith.truncf %6 : vector<32x8xf32> to vector<32x8xbf16>
    %cst_9 = arith.constant dense<0.000000e+00> : vector<32x16xf32>
    %8 = tpu.matmul %7, %3, %cst_9 {dimension_numbers = #tpu.dot_dimension_numbers<[1], [0], [0], [1], [0, 0, 1, 1], [], []>} : vector<32x8xbf16>, vector<8x16xbf16>, vector<32x16xf32> -> vector<32x16xf32>
    %9 = vector.broadcast %4 : vector<1x16xf32> to vector<32x16xf32>
    %10 = arith.addf %8, %9 : vector<32x16xf32>
    %cst_10 = arith.constant 0.000000e+00 : f32
    %11 = vector.broadcast %cst_10 : f32 to vector<32x16xf32>
    %12 = arith.maximumf %10, %11 : vector<32x16xf32>
    %c0_11 = arith.constant 0 : index
    %c8 = arith.constant 8 : index
    %13 = vector.load %arg9[%c0_11, %c8] : memref<32x48xf32, #tpu.memory_space<vmem>>, vector<32x16xf32>
    tpu.vector_store %arg9[%c0_11, %c8], %12 {strides = array<i32>} : memref<32x48xf32, #tpu.memory_space<vmem>>, vector<32x16xf32>,
    %c0_12 = arith.constant 0 : index
    %c0_13 = arith.constant 0 : index
    %14 = vector.load %arg5[%c0_12, %c0_13] : memref<16x16xbf16, #tpu.memory_space<vmem>>, vector<16x16xbf16>
    %c0_14 = arith.constant 0 : index
    %c0_15 = arith.constant 0 : index
    %15 = vector.load %arg6[%c0_14, %c0_15] : memref<1x16xf32, #tpu.memory_space<vmem>>, vector<1x16xf32>
    %16 = arith.truncf %12 : vector<32x16xf32> to vector<32x16xbf16>
    %cst_16 = arith.constant dense<0.000000e+00> : vector<32x16xf32>
    %17 = tpu.matmul %0, %16, %cst_16 {dimension_numbers = #tpu.dot_dimension_numbers<[1], [0], [0], [1], [0, 0, 1, 1], [], []>} : vector<32x32xbf16>, vector<32x16xbf16>, vector<32x16xf32> -> vector<32x16xf32>
    %18 = arith.truncf %17 : vector<32x16xf32> to vector<32x16xbf16>
    %cst_17 = arith.constant dense<0.000000e+00> : vector<32x16xf32>
    %19 = tpu.matmul %18, %14, %cst_17 {dimension_numbers = #tpu.dot_dimension_numbers<[1], [0], [0], [1], [0, 0, 1, 1], [], []>} : vector<32x16xbf16>, vector<16x16xbf16>, vector<32x16xf32> -> vector<32x16xf32>
    %20 = vector.broadcast %15 : vector<1x16xf32> to vector<32x16xf32>
    %21 = arith.addf %19, %20 : vector<32x16xf32>
    %cst_18 = arith.constant 0.000000e+00 : f32
    %22 = vector.broadcast %cst_18 : f32 to vector<32x16xf32>
    %23 = arith.maximumf %21, %22 : vector<32x16xf32>
    %c0_19 = arith.constant 0 : index
    %c24 = arith.constant 24 : index
    %24 = vector.load %arg9[%c0_19, %c24] : memref<32x48xf32, #tpu.memory_space<vmem>>, vector<32x16xf32>
    tpu.vector_store %arg9[%c0_19, %c24], %23 {strides = array<i32>} : memref<32x48xf32, #tpu.memory_space<vmem>>, vector<32x16xf32>,
    %c0_20 = arith.constant 0 : index
    %c0_21 = arith.constant 0 : index
    %25 = vector.load %arg7[%c0_20, %c0_21] : memref<16x8xbf16, #tpu.memory_space<vmem>>, vector<16x8xbf16>
    %c0_22 = arith.constant 0 : index
    %c0_23 = arith.constant 0 : index
    %26 = vector.load %arg8[%c0_22, %c0_23] : memref<1x8xf32, #tpu.memory_space<vmem>>, vector<1x8xf32>
    %27 = arith.truncf %23 : vector<32x16xf32> to vector<32x16xbf16>
    %cst_24 = arith.constant dense<0.000000e+00> : vector<32x16xf32>
    %28 = tpu.matmul %0, %27, %cst_24 {dimension_numbers = #tpu.dot_dimension_numbers<[1], [0], [0], [1], [0, 0, 1, 1], [], []>} : vector<32x32xbf16>, vector<32x16xbf16>, vector<32x16xf32> -> vector<32x16xf32>
    %29 = arith.truncf %28 : vector<32x16xf32> to vector<32x16xbf16>
    %cst_25 = arith.constant dense<0.000000e+00> : vector<32x8xf32>
    %30 = tpu.matmul %29, %25, %cst_25 {dimension_numbers = #tpu.dot_dimension_numbers<[1], [0], [0], [1], [0, 0, 1, 1], [], []>} : vector<32x16xbf16>, vector<16x8xbf16>, vector<32x8xf32> -> vector<32x8xf32>
    %31 = vector.broadcast %26 : vector<1x8xf32> to vector<32x8xf32>
    %32 = arith.addf %30, %31 : vector<32x8xf32>
    %c0_26 = arith.constant 0 : index
    %c40 = arith.constant 40 : index
    %33 = vector.load %arg9[%c0_26, %c40] : memref<32x48xf32, #tpu.memory_space<vmem>>, vector<32x8xf32>
    tpu.vector_store %arg9[%c0_26, %c40], %32 {strides = array<i32>} : memref<32x48xf32, #tpu.memory_space<vmem>>, vector<32x8xf32>,
    return
  }
  func.func @transform_0(%arg0: i32) -> (i32, i32) {
    %c0_i32 = arith.constant 0 : i32
    %c0_i32_0 = arith.constant 0 : i32
    %c0_i32_1 = arith.constant 0 : i32
    return %c0_i32, %c0_i32_0 : i32, i32
  }
  func.func @transform_1(%arg0: i32) -> (i32, i32) {
    %c0_i32 = arith.constant 0 : i32
    %c0_i32_0 = arith.constant 0 : i32
    %c0_i32_1 = arith.constant 0 : i32
    return %c0_i32, %c0_i32_0 : i32, i32
  }
  func.func @transform_2(%arg0: i32) -> (i32, i32) {
    %c0_i32 = arith.constant 0 : i32
    %c0_i32_0 = arith.constant 0 : i32
    %c0_i32_1 = arith.constant 0 : i32
    return %c0_i32, %c0_i32_0 : i32, i32
  }
  func.func @transform_3(%arg0: i32) -> (i32, i32) {
    %c0_i32 = arith.constant 0 : i32
    %c0_i32_0 = arith.constant 0 : i32
    %c0_i32_1 = arith.constant 0 : i32
    return %c0_i32, %c0_i32_0 : i32, i32
  }
  func.func @transform_4(%arg0: i32) -> (i32, i32) {
    %c0_i32 = arith.constant 0 : i32
    %c0_i32_0 = arith.constant 0 : i32
    %c0_i32_1 = arith.constant 0 : i32
    return %c0_i32, %c0_i32_0 : i32, i32
  }
  func.func @transform_5(%arg0: i32) -> (i32, i32) {
    %c0_i32 = arith.constant 0 : i32
    %c0_i32_0 = arith.constant 0 : i32
    %c0_i32_1 = arith.constant 0 : i32
    return %c0_i32, %c0_i32_0 : i32, i32
  }
  func.func @transform_6(%arg0: i32) -> (i32, i32) {
    %c0_i32 = arith.constant 0 : i32
    %c0_i32_0 = arith.constant 0 : i32
    %c0_i32_1 = arith.constant 0 : i32
    return %c0_i32, %c0_i32_0 : i32, i32
  }
  func.func @transform_7(%arg0: i32) -> (i32, i32) {
    %c0_i32 = arith.constant 0 : i32
    %c0_i32_0 = arith.constant 0 : i32
    %c0_i32_1 = arith.constant 0 : i32
    return %c0_i32, %c0_i32_0 : i32, i32
  }
  func.func @transform_8(%arg0: i32) -> (i32, i32) {
    %c0_i32 = arith.constant 0 : i32
    %c0_i32_0 = arith.constant 0 : i32
    %c0_i32_1 = arith.constant 0 : i32
    return %c0_i32, %c0_i32_0 : i32, i32
  }
}

</mosaic_0001>

<bundles_post_ra>
// kernel: tpu_custom_call.1
= control target key start
LH: loop header
LB: loop body
LE: loop exit
PB: predicated region body
PF: predicated region fallthrough
CT: control target
= control target key end

     0   :  { %vm39_vm0 = vcmask 64512   ;;  %vm58_vm1 = vcmask 261120   ;;  %s755_s0 = inlined_call_operand.vmem [shape: bf16[32,32], index: 0, kind: input, shape index: {}]   ;;  %s756_s1 = inlined_call_operand.vmem [shape: f32[32,8], index: 1, kind: input, shape index: {}]   ;;  %s757_s2 = inlined_call_operand.vmem [shape: bf16[8,16], index: 2, kind: input, shape index: {}]   ;;  %s758_s3 = inlined_call_operand.vmem [shape: f32[1,16], index: 3, kind: input, shape index: {}]   ;;  %s759_s4 = inlined_call_operand.vmem [shape: bf16[16,16], index: 4, kind: input, shape index: {}]   ;;  %s760_s5 = inlined_call_operand.vmem [shape: f32[1,16], index: 5, kind: input, shape index: {}]   ;;  %s761_s6 = inlined_call_operand.vmem [shape: bf16[16,8], index: 6, kind: input, shape index: {}]   ;;  %s762_s7 = inlined_call_operand.vmem [shape: f32[1,8], index: 7, kind: input, shape index: {}]   ;;  %s763_s8 = inlined_call_operand.hbm [shape: f32[32,48], index: 8, kind: output, shape index: {}]  }
   0x1   :  { %v35_v0 = vld [vmem:[%s756_s1] sm:$0xff]  ;;  %v36_v1 = vld [vmem:[%s756_s1 + $0x8] sm:$0xff]  ;;  %v37_v2 = vld [vmem:[%s756_s1 + $0x10] sm:$0xff] }
   0x2   :  { %40 = vst.msk [vmem:[#allocation2] sm:$0xff] %vm39_vm0, %v35_v0  ;;  %41 = vst.msk [vmem:[#allocation2 + $0x8] sm:$0xff] %vm39_vm0, %v36_v1  ;;  %v46_v3 = vpack.c.bf16 %v36_v1, %v35_v0  ;;  %v38_v4 = vld [vmem:[%s756_s1 + $0x18] sm:$0xff]  ;;  %v603_v6 = vld [vmem:[%s755_s0] sm:$0xff]  }
   0x3   :  { %42 = vst.msk [vmem:[#allocation2 + $0x10] sm:$0xff] %vm39_vm0, %v37_v2  ;;  %v47_v5 = vpack.c.bf16 %v38_v4, %v37_v2  ;;  %43 = vst.msk [vmem:[#allocation2 + $0x18] sm:$0xff] %vm39_vm0, %v38_v4  ;;  %559 = vmatprep.mubr.msk.bf16.mxu0 %vm58_vm1, %v603_v6 }
   0x4   :  { %555 = vmatprep.subr.bf16.mxu0 %v46_v3 }
   0x5   :  { %556 = vmatpush3.bf16.msra.mxu0 %v46_v3 }
   0x6   :  { %13 = vsyncpa [#allocation3], 0  ;;  %557 = vmatprep.subr.bf16.mxu0 %v47_v5  ;;  %v704_v7 = vld [vmem:[%s755_s0 + $0x8] sm:$0xff]   ;;  %v44_v8 = vld [vmem:[%s757_s2] sm:$0xf]  ;;  %vm128_vm2 = vcmask 1043456  }
   0x7   :  { %597 = vmatprep.subr.msk.bf16.mxu1 %vm128_vm2, %v44_v8  ;;  %v130_v9 = vsel %vm128_vm2, %v44_v8, 0  ;;  %v605_v16 = vld [vmem:[%s759_s4] sm:$0xff]   ;;  %s631_s20 = smov 8   ;;  %vm201_vm3 = vcmask 195648   ;;  %vm274_vm4 = vcmask 130048   ;;  %s632_s23 = smov 24  }
   0x8   :  { %564 = vmatpush3.bf16.msra.mxu1 %v130_v9  ;;  %v519_v17 = vld [vmem:[%s758_s3] ss:$0 sm:$0xff]  ;;  %vm350_vm5 = vcmask 326848   ;;  %s633_s24 = smov 40   ;;  %vm494_vm6 = vcmask 392512   ;;  %s634_s25 = smov [#allocation2]  }
   0x9   :  { %558 = vmatpush3.bf16.msra.mxu0 %v47_v5  ;;  %v524_v42 = vld [vmem:[%s760_s5] ss:$0 sm:$0xff]  ;;  %s504_s26 = sshll.u32 %s634_s25, 4  ;;  %s505_s26 = int_to_ptr.vmem [resolvable:$true] %s504_s26 }
   0xa   :  { %577 = vmatprep.subr.bf16.mxu0 %v605_v16  ;;  %v606_v43 = vld [vmem:[%s761_s6] sm:$0xff]   ;;  %p612_p1 = scmp.lt.s32.totalorder %s505_s26, %s505_s26 }
   0xb   :  { %v530_v4 = vld [vmem:[%s762_s7] ss:$0 sm:$0xff]  ;;  %s607_s7 = scalar_lea.vmem %s505_s26, 512 }
   0xc   :  { %560 = vmatmul.mubr.msk.bf16.vlgmr.msra.gmra.mrb[0].mxu0 %vm58_vm1, %v704_v7  ;;  %p608_p0 = scmp.ne.s32.totalorder %s505_s26, %s607_s7  ;;  %p613_p2 = scmp.lt.s32.totalorder %s607_s7, %s607_s7 }
   0xd   :  { %578 = vmatpush3.bf16.msra.mxu0 %v605_v16 }
   0xe   :  { %591 = vmatprep.subr.bf16.mxu0 %v606_v43  ;;  %p614_p3 = por %p613_p2, %p612_p1 }
  0x10   :  { %p615_p4 = pnand %p614_p3, %p608_p0 }
  0xdf   :  { %v561_v10 = vpop.f32.mrb[0].mxu0 }
  0xe0   :  { %v99_v11 = vpop.f32.mrb[1].mxu0 }
  0xe1   :  { %v562_v12 = vpop.f32.mrb[2].mxu0 }
  0xe2   :  { %v115_v13 = vpack.c.bf16 %v562_v12, %v561_v10  ;;  %v102_v14 = vpop.f32.mrb[3].mxu0 }
  0xe3   :  { %v114_v15 = vpack.c.bf16 %v102_v14, %v99_v11 }
  0xe5   :  { %565 = vmatprep.mubr.msk.bf16.mxu1 %vm39_vm0, %v114_v15 }
  0xe6   :  { %566 = vmatmul.mubr.msk.bf16.vlgmr.msra.gmra.mrb[0].mxu1 %vm39_vm0, %v115_v13 }
  0xe7   :  { %573 = vmatprep.mubr.msk.bf16.mxu1 %vm58_vm1, %v603_v6 }
 0x1b9   :  { %v567_v18 = vpop.f32.mrb[0].mxu1 }
 0x1ba   :  { %v175_v19 = vadd.f32 %v567_v18, %v519_v17  ;;  %v166_v20 = vpop.f32.mrb[1].mxu1 }
 0x1bb   :  { %v167_v21 = vadd.f32 %v519_v17, %v166_v20  ;;  %v568_v22 = vpop.f32.mrb[2].mxu1 }
 0x1bc   :  { %v183_v23 = vmax.f32 %v175_v19, 0.0  ;;  %v178_v24 = vadd.f32 %v568_v22, %v519_v17  ;;  %v169_v25 = vpop.f32.mrb[3].mxu1 }
 0x1bd   :  { %v181_v26 = vmax.f32 %v167_v21, 0.0  ;;  %v170_v27 = vadd.f32 %v519_v17, %v169_v25 }
 0x1be   :  { %v184_v28 = vmax.f32 %v178_v24, 0.0  ;;  %193 = vrot.lane.b32.xlu1 %v183_v23, %s631_s20 }
 0x1bf   :  { %v182_v29 = vmax.f32 %v170_v27, 0.0  ;;  %189 = vrot.lane.b32.xlu0 %v181_v26, %s631_s20 }
 0x1c0   :  { %v210_v30 = vpack.c.bf16 %v184_v28, %v183_v23 }
 0x1c1   :  { %v209_v31 = vpack.c.bf16 %v182_v29, %v181_v26 }
 0x1c2   :  { %195 = vrot.lane.b32.xlu1 %v184_v28, %s631_s20 }
 0x1c3   :  { %191 = vrot.lane.b32.xlu0 %v182_v29, %s631_s20  ;;  %569 = vmatprep.subr.bf16.mxu1 %v209_v31 }
 0x1c4   :  { %570 = vmatpush3.bf16.msra.mxu1 %v209_v31 }
 0x1c5   :  { %571 = vmatprep.subr.bf16.mxu1 %v210_v30 }
 0x1c8   :  { %572 = vmatpush3.bf16.msra.mxu1 %v210_v30 }
 0x1cb   :  { %574 = vmatmul.mubr.msk.bf16.vlgmr.msra.gmra.mrb[4].mxu1 %vm58_vm1, %v704_v7 }
 0x1cc   :  { %587 = vmatprep.mubr.msk.bf16.mxu1 %vm58_vm1, %v603_v6 }
 0x230   :  { %v194_v32 = vpop.permute.xlu1 %193 }
 0x231   :  { %204 = vst.msk [vmem:[#allocation2 + $0x10] sm:$0xff] %vm201_vm3, %v194_v32  ;;  %v190_v33 = vpop.permute.xlu0 %189 }
 0x232   :  { %202 = vst.msk [vmem:[#allocation2] sm:$0xff] %vm201_vm3, %v190_v33 }
 0x234   :  { %v196_v34 = vpop.permute.xlu1 %195 }
 0x235   :  { %205 = vst.msk [vmem:[#allocation2 + $0x18] sm:$0xff] %vm201_vm3, %v196_v34  ;;  %v192_v35 = vpop.permute.xlu0 %191 }
 0x236   :  { %203 = vst.msk [vmem:[#allocation2 + $0x8] sm:$0xff] %vm201_vm3, %v192_v35 }
 0x29e   :  { %v575_v36 = vpop.f32.mrb[4].mxu1 }
 0x29f   :  { %v245_v37 = vpop.f32.mrb[5].mxu1 }
 0x2a0   :  { %v576_v38 = vpop.f32.mrb[6].mxu1 }
 0x2a1   :  { %v261_v39 = vpack.c.bf16 %v576_v38, %v575_v36  ;;  %v248_v40 = vpop.f32.mrb[7].mxu1 }
 0x2a2   :  { %v260_v41 = vpack.c.bf16 %v248_v40, %v245_v37 }
 0x2a4   :  { %579 = vmatprep.mubr.msk.bf16.mxu0 %vm274_vm4, %v260_v41 }
 0x2a5   :  { %580 = vmatmul.mubr.msk.bf16.vlgmr.msra.gmra.mrb[4].mxu0 %vm274_vm4, %v261_v39 }
 0x2a6   :  { %592 = vmatpush3.bf16.msra.mxu0 %v606_v43 }
 0x378   :  { %v581_v44 = vpop.f32.mrb[4].mxu0 }
 0x379   :  { %v324_v45 = vadd.f32 %v581_v44, %v524_v42  ;;  %v315_v46 = vpop.f32.mrb[5].mxu0 }
 0x37a   :  { %v316_v47 = vadd.f32 %v524_v42, %v315_v46  ;;  %v582_v48 = vpop.f32.mrb[6].mxu0 }
 0x37b   :  { %v332_v49 = vmax.f32 %v324_v45, 0.0  ;;  %v327_v50 = vadd.f32 %v582_v48, %v524_v42  ;;  %v318_v51 = vpop.f32.mrb[7].mxu0 }
 0x37c   :  { %v319_v52 = vadd.f32 %v524_v42, %v318_v51  ;;  %v330_v54 = vmax.f32 %v316_v47, 0.0 }
 0x37d   :  { %v333_v53 = vmax.f32 %v327_v50, 0.0  ;;  %342 = vrot.lane.b32.xlu0 %v332_v49, %s632_s23 }
 0x37e   :  { %v331_v55 = vmax.f32 %v319_v52, 0.0 }
 0x37f   :  { %v359_v56 = vpack.c.bf16 %v333_v53, %v332_v49  ;;  %344 = vrot.lane.b32.xlu1 %v333_v53, %s632_s23 }
 0x380   :  { %v358_v57 = vpack.c.bf16 %v331_v55, %v330_v54 }
 0x381   :  { %338 = vrot.lane.b32.xlu0 %v330_v54, %s632_s23 }
 0x382   :  { %583 = vmatprep.subr.bf16.mxu1 %v358_v57 }
 0x383   :  { %340 = vrot.lane.b32.xlu1 %v331_v55, %s632_s23  ;;  %584 = vmatpush3.bf16.msra.mxu1 %v358_v57 }
 0x384   :  { %585 = vmatprep.subr.bf16.mxu1 %v359_v56 }
 0x387   :  { %586 = vmatpush3.bf16.msra.mxu1 %v359_v56 }
 0x38a   :  { %588 = vmatmul.mubr.msk.bf16.vlgmr.msra.gmra.mrb[8].mxu1 %vm58_vm1, %v704_v7 }
 0x3ef   :  { %v343_v58 = vpop.permute.xlu0 %342 }
 0x3f0   :  { %353 = vst.msk [vmem:[#allocation2 + $0x10] sm:$0xff] %vm350_vm5, %v343_v58 }
 0x3f1   :  { %v345_v59 = vpop.permute.xlu1 %344 }
 0x3f2   :  { %354 = vst.msk [vmem:[#allocation2 + $0x18] sm:$0xff] %vm350_vm5, %v345_v59 }
 0x3f3   :  { %v339_v60 = vpop.permute.xlu0 %338 }
 0x3f4   :  { %351 = vst.msk [vmem:[#allocation2] sm:$0xff] %vm350_vm5, %v339_v60 }
 0x3f5   :  { %v341_v61 = vpop.permute.xlu1 %340 }
 0x3f6   :  { %352 = vst.msk [vmem:[#allocation2 + $0x8] sm:$0xff] %vm350_vm5, %v341_v61 }
 0x45d   :  { %v589_v62 = vpop.f32.mrb[8].mxu1 }
 0x45e   :  { %v394_v63 = vpop.f32.mrb[9].mxu1 }
 0x45f   :  { %v590_v0 = vpop.f32.mrb[10].mxu1 }
 0x460   :  { %v410_v1 = vpack.c.bf16 %v590_v0, %v589_v62  ;;  %v397_v2 = vpop.f32.mrb[11].mxu1 }
 0x461   :  { %v409_v3 = vpack.c.bf16 %v397_v2, %v394_v63 }
 0x463   :  { %593 = vmatprep.mubr.msk.bf16.mxu0 %vm274_vm4, %v409_v3 }
 0x464   :  { %594 = vmatmul.mubr.msk.bf16.vlgmr.msra.gmra.mrb[8].mxu0 %vm274_vm4, %v410_v1 }
 0x537   :  { %v595_v5 = vpop.f32.mrb[8].mxu0 }
 0x538   :  { %v463_v6 = vpop.f32.mrb[9].mxu0  ;;  %v472_v11 = vadd.f32 %v595_v5, %v530_v4 }
 0x539   :  { %v464_v7 = vadd.f32 %v530_v4, %v463_v6  ;;  %v596_v8 = vpop.f32.mrb[10].mxu0 }
 0x53a   :  { %v466_v9 = vpop.f32.mrb[11].mxu0  ;;  %v475_v12 = vadd.f32 %v596_v8, %v530_v4 }
 0x53b   :  { %v467_v10 = vadd.f32 %v530_v4, %v466_v9  ;;  %482 = vrot.lane.b32.xlu0 %v464_v7, %s633_s24 }
 0x53d   :  { %484 = vrot.lane.b32.xlu1 %v467_v10, %s633_s24 }
 0x53f   :  { %486 = vrot.lane.b32.xlu0 %v472_v11, %s633_s24 }
 0x541   :  { %488 = vrot.lane.b32.xlu1 %v475_v12, %s633_s24 }
 0x5ad   :  { %v483_v13 = vpop.permute.xlu0 %482 }
 0x5ae   :  { %495 = vst.msk [vmem:[#allocation2] sm:$0xff] %vm494_vm6, %v483_v13 }
 0x5af   :  { %v485_v14 = vpop.permute.xlu1 %484 }
 0x5b0   :  { %496 = vst.msk [vmem:[#allocation2 + $0x8] sm:$0xff] %vm494_vm6, %v485_v14 }
 0x5b1   :  { %v487_v15 = vpop.permute.xlu0 %486 }
 0x5b2   :  { %497 = vst.msk [vmem:[#allocation2 + $0x10] sm:$0xff] %vm494_vm6, %v487_v15 }
 0x5b3   :  { %v489_v16 = vpop.permute.xlu1 %488 }
 0x5b4   :  { %498 = vst.msk [vmem:[#allocation2 + $0x18] sm:$0xff] %vm494_vm6, %v489_v16 }
 0x5b5   :  { %618 = shalt.err (!%p615_p4)
}
 0x5b6   :  { %s619_s29 = scalar_lea.hbm %s763_s8, 512 }
 0x5b7   :  { %p620_p5 = scmp.ne.s32.totalorder %s763_s8, %s619_s29  ;;  %p623_p6 = scmp.lt.u32.totalorder %s619_s29, %s763_s8 }
 0x5b9   :  { %p625_p7 = pnand %p623_p6, %p620_p5 }
 0x5bb   :  { %628 = shalt.err (!%p625_p7)
}
 0x5bc   :  { %s635_s12 = smov 128  }
 0x5bd   :  { %510 = dma.vmem_to_hbm [thread:$0]  %s505_s26, 512, %s763_s8, [#allocation3], %s635_s12, %s635_s12, %s631_s20  }
 0x5be   :  { %629 = dma.done.wait [#allocation3], 512  }
 0x5bf   :  { %630 = vsyncadd [#allocation3], 4294966784 }
 0x5c0   :  { %514 = vsyncpa [#allocation3], 1 }

</bundles_post_ra>
